<compile_context>
chip_gen: v6e
topology: v6e:2x2x1
jax: 0.10.0
libtpu: 0.0.40
codegen_flags: <defaults>
</compile_context>

<pallas_src>
import jax
import jax.numpy as jnp
from jax.experimental import pallas as pl
from jax.experimental.pallas import tpu as pltpu


# ----------------------------- small helpers -------------------------------

def _round_up(v, m):
    return ((v + m - 1) // m) * m


def _choose_row_tile(n_rows, *, align=8, max_rows=4096, min_steps=1):
    """Largest row tile (multiple of `align`, <= max_rows); with min_steps > 1
    the tile is shrunk so the grid has at least that many steps (v7x: 2 TCs)."""
    tile = min(max_rows, _round_up(n_rows, align))
    if min_steps > 1:
        tile = min(tile, _round_up(max(1, -(-n_rows // min_steps)), align))
    return max(align, tile)


def _leaky_relu(x, slope=0.2):
    return jnp.where(x >= 0, x, slope * x)


def _instance_norm_rows(h, eps=1e-5):
    # nn.InstanceNorm1d on a 2-D (N, C) tensor -> per-row normalization over
    # features, biased variance.  One-pass moments: var = E[x^2] - mu^2.
    mu = jnp.mean(h, axis=-1, keepdims=True)
    ex2 = jnp.mean(h * h, axis=-1, keepdims=True)
    var = jnp.maximum(ex2 - mu * mu, 0.0)
    return (h - mu) * jax.lax.rsqrt(var + eps)


# --------------------------------- kernel -----------------------------------

def _genblock_kernel(xw_ref, n1_ref, n2_ref,
                     fused_w_ref, lin1_w_ref, consts_ref, o_ref):
    C = lin1_w_ref.shape[-1]

    consts = consts_ref[...]                 # (8, 4*C): one resident slab
    lin1_b = consts[0:1, :C]
    nw1 = consts[1:2, :C]
    nw2 = consts[2:3, :C]
    style_b = consts[3:4, :]                 # [ss1_b | sb1_b | ss2_b | sb2_b]

    # Upcast streamed bf16 operands before any VPU math (v5e VPU has no bf16).
    xw = xw_ref[...].astype(jnp.float32)     # (T, C_in + w_dim)
    n1 = n1_ref[...].astype(jnp.float32)
    n2 = n2_ref[...].astype(jnp.float32)

    # One fused block-diagonal matmul: [x | w] @ [[lin1_w, 0], [0, style_w]]
    # -> columns [0:C) = lin1(x) pre-bias, columns [C:5C) = all four styles.
    hs = jnp.dot(xw, fused_w_ref[...], preferred_element_type=jnp.float32)
    h = hs[:, :C] + lin1_b
    style = hs[:, C:] + style_b
    ss1 = style[:, 0 * C:1 * C]
    sb1 = style[:, 1 * C:2 * C]
    ss2 = style[:, 2 * C:3 * C]
    sb2 = style[:, 3 * C:4 * C]

    # ---- stage 1: lin1 -> inject_noise1 -> leaky -> adain1 ----
    h = h + nw1 * n1
    h = _leaky_relu(h)
    x1 = ss1 * _instance_norm_rows(h) + sb1

    # ---- stage 2: lin1 AGAIN (as in the reference module) -> noise2 -> adain2
    h = jnp.dot(x1, lin1_w_ref[...], preferred_element_type=jnp.float32) + lin1_b
    h = h + nw2 * n2
    h = _leaky_relu(h)
    o_ref[...] = (ss2 * _instance_norm_rows(h) + sb2).astype(o_ref.dtype)


# --------------------------- parameter packing ------------------------------

def pack_params(params):
    """One-time setup: fold WSLinear scales into the weights, build the
    block-diagonal fused weight for the stage-1 [x|w] matmul, and consolidate
    every (1, C) constant into a single (8, 4*C) slab."""
    c_in, c_out = params["lin1_w"].shape
    w_dim = params["ss1_w"].shape[0]
    scale_lin = (2.0 / c_in) ** 0.5
    scale_style = (2.0 / w_dim) ** 0.5

    lin1_w = (params["lin1_w"] * scale_lin).astype(jnp.float32)
    style_w = (jnp.concatenate([params["ss1_w"], params["sb1_w"],
                                params["ss2_w"], params["sb2_w"]], axis=1)
               * scale_style).astype(jnp.float32)             # (w_dim, 4*c_out)

    fused_w = jnp.zeros((c_in + w_dim, 5 * c_out), jnp.float32)
    fused_w = fused_w.at[:c_in, :c_out].set(lin1_w)
    fused_w = fused_w.at[c_in:, c_out:].set(style_w)

    consts = jnp.zeros((8, 4 * c_out), jnp.float32)
    consts = consts.at[0, :c_out].set(params["lin1_b"][0])
    consts = consts.at[1, :c_out].set(params["noise_w1"][0])
    consts = consts.at[2, :c_out].set(params["noise_w2"][0])
    consts = consts.at[3, :].set(jnp.concatenate(
        [params["ss1_b"][0], params["sb1_b"][0],
         params["ss2_b"][0], params["sb2_b"][0]]))
    return {"fused_w": fused_w, "lin1_w": lin1_w, "consts": consts}


# --------------------------------- wrapper ----------------------------------

def genblock_forward(x, w, noise1, noise2, packed, *,
                     max_rows_per_tile=4096,   # sweep 512..8192; VMEM-safe on all gens
                     min_grid_steps=1,         # set 2 on v7x so both TCs get work
                     stream_dtype=jnp.bfloat16):
    N, c_in = x.shape
    w_dim = w.shape[1]
    c_out = packed["lin1_w"].shape[1]
    # Stage 2 reuses lin1 (as in the PyTorch module) -> requires C_in == C_out.
    assert c_in == c_out, "GenBlock.forward reuses lin1; requires C_in == C_out"

    row_tile = _choose_row_tile(N, max_rows=max_rows_per_tile,
                                min_steps=min_grid_steps)
    n_pad = _round_up(N, row_tile)

    # Concatenate x and w once (host-side layout plumbing): one streamed
    # operand instead of two, and it directly feeds the fused stage-1 matmul.
    xw = jnp.concatenate([x, w], axis=1).astype(stream_dtype)
    n1 = noise1.astype(stream_dtype)
    n2 = noise2.astype(stream_dtype)
    if n_pad != N:
        pad = ((0, n_pad - N), (0, 0))
        xw = jnp.pad(xw, pad)
        n1 = jnp.pad(n1, pad)
        n2 = jnp.pad(n2, pad)

    grid = (n_pad // row_tile,)

    def row_spec(cols):
        # Streamed per-row operands; if DMA is still exposed after the tile
        # enlargement, add pipeline_mode=pl.Buffered(3) here.
        return pl.BlockSpec((row_tile, cols), lambda i: (i, 0))

    def resident_spec(shape):
        # Constant index_map -> the block stays VMEM-resident across steps.
        return pl.BlockSpec(shape, lambda i: (0, 0))

    out = pl.pallas_call(
        _genblock_kernel,
        out_shape=jax.ShapeDtypeStruct((n_pad, c_out), jnp.float32),
        grid=grid,
        in_specs=[
            row_spec(c_in + w_dim),                 # [x | w]   (bf16 stream)
            row_spec(c_out),                        # noise1    (bf16 stream)
            row_spec(c_out),                        # noise2    (bf16 stream)
            resident_spec(packed["fused_w"].shape),  # block-diag lin1+style weight
            resident_spec(packed["lin1_w"].shape),   # lin1 weight (stage 2)
            resident_spec(packed["consts"].shape),   # packed biases / noise weights
        ],
        out_specs=pl.BlockSpec((row_tile, c_out), lambda i: (i, 0)),
        compiler_params=pltpu.CompilerParams(
            dimension_semantics=("parallel",)),      # rows independent -> megacore
    )(xw, n1, n2, packed["fused_w"], packed["lin1_w"], packed["consts"])
    return out[:N]


# ------------------------- pure-JAX reference (f32) -------------------------

def genblock_reference(x, w, noise1, noise2, params):
    """Mirrors the PyTorch forward with unpacked params (torch-style two-pass
    instance-norm variance)."""
    c_in = x.shape[1]
    w_dim = w.shape[1]
    scale_lin = (2.0 / c_in) ** 0.5
    scale_style = (2.0 / w_dim) ** 0.5

    def inorm(h, eps=1e-5):
        mu = jnp.mean(h, axis=-1, keepdims=True)
        var = jnp.mean((h - mu) ** 2, axis=-1, keepdims=True)
        return (h - mu) * jax.lax.rsqrt(var + eps)

    def stage(xx, noise, nw, ssw, ssb, sbw, sbb):
        h = (xx * scale_lin) @ params["lin1_w"] + params["lin1_b"]
        h = h + nw * noise
        h = _leaky_relu(h)
        hn = inorm(h)
        ss = (w * scale_style) @ ssw + ssb
        sb = (w * scale_style) @ sbw + sbb
        return ss * hn + sb

    x1 = stage(x, noise1, params["noise_w1"],
               params["ss1_w"], params["ss1_b"], params["sb1_w"], params["sb1_b"])
    return stage(x1, noise2, params["noise_w2"],
                 params["ss2_w"], params["ss2_b"], params["sb2_w"], params["sb2_b"])


# ------------------------------ param builders -------------------------------

def make_params(key, in_channels, out_channels, w_dim):
    """Module __init__ state: normal WSLinear weights, zero biases, zero noise
    weights."""
    ks = jax.random.split(key, 5)
    return {
        "lin1_w": jax.random.normal(ks[0], (in_channels, out_channels), jnp.float32),
        "lin1_b": jnp.zeros((1, out_channels), jnp.float32),
        "noise_w1": jnp.zeros((1, out_channels), jnp.float32),
        "noise_w2": jnp.zeros((1, out_channels), jnp.float32),
        "ss1_w": jax.random.normal(ks[1], (w_dim, out_channels), jnp.float32),
        "ss1_b": jnp.zeros((1, out_channels), jnp.float32),
        "sb1_w": jax.random.normal(ks[2], (w_dim, out_channels), jnp.float32),
        "sb1_b": jnp.zeros((1, out_channels), jnp.float32),
        "ss2_w": jax.random.normal(ks[3], (w_dim, out_channels), jnp.float32),
        "ss2_b": jnp.zeros((1, out_channels), jnp.float32),
        "sb2_w": jax.random.normal(ks[4], (w_dim, out_channels), jnp.float32),
        "sb2_b": jnp.zeros((1, out_channels), jnp.float32),
    }


def make_params_random(key, in_channels, out_channels, w_dim):
    """Randomized non-zero biases and noise weights: exercises the consts-slab
    packing, the noise-injection path, and the lin1 bias (per review)."""
    p = make_params(key, in_channels, out_channels, w_dim)
    ks = jax.random.split(jax.random.fold_in(key, 1), 7)
    for i, name in enumerate(["lin1_b", "noise_w1", "noise_w2",
                              "ss1_b", "sb1_b", "ss2_b", "sb2_b"]):
        p[name] = 0.5 * jax.random.normal(ks[i], (1, out_channels), jnp.float32)
    return p


# ----------------------------------- main ------------------------------------

if __name__ == "__main__":
    N, C_IN, C_OUT, W_DIM = 64, 32, 32, 16

    key = jax.random.PRNGKey(0)
    k_x, k_w, k_n1, k_n2, k_p, k_p2 = jax.random.split(key, 6)

    # Pre-round all streamed operands to bf16 so the kernel's bf16 streaming is
    # bit-identical to what the f32 reference consumes (kernel compute is f32).
    def bf16_round(a):
        return a.astype(jnp.bfloat16).astype(jnp.float32)

    x = bf16_round(jax.random.normal(k_x, (N, C_IN), jnp.float32))
    w = bf16_round(jax.random.normal(k_w, (N, W_DIM), jnp.float32))
    # torch.randn noise is generated inside InjectNoise.forward; it is generated
    # here in the wrapper so kernel and reference see identical noise.
    # TODO(synk): optionally generate noise in-kernel with pltpu.prng_seed +
    # pltpu.prng_random_bits to cut ~44% of input HBM bytes when bit-compat
    # with host-generated noise is not required.
    noise1 = bf16_round(jax.random.normal(k_n1, (N, C_OUT), jnp.float32))
    noise2 = bf16_round(jax.random.normal(k_n2, (N, C_OUT), jnp.float32))

    # --- check 1: module-init state (zero biases / zero noise weights) ---
    params = make_params(k_p, C_IN, C_OUT, W_DIM)
    out = genblock_forward(x, w, noise1, noise2, pack_params(params))
    out = jax.block_until_ready(out)
    ref = genblock_reference(x, w, noise1, noise2, params)
    assert out.shape == (N, C_OUT)
    assert jnp.allclose(out, ref, atol=2e-3, rtol=2e-3), "mismatch (init params)"

    # --- check 2: randomized non-zero biases / noise weights ---
    params_rnd = make_params_random(k_p2, C_IN, C_OUT, W_DIM)
    out2 = genblock_forward(x, w, noise1, noise2, pack_params(params_rnd))
    out2 = jax.block_until_ready(out2)
    ref2 = genblock_reference(x, w, noise1, noise2, params_rnd)
    assert jnp.allclose(out2, ref2, atol=2e-3, rtol=2e-3), "mismatch (random params)"

    print("KERNEL_OK")
</pallas_src>

<mosaic_0001>
module attributes {stable_mosaic.version = 11 : i64} {
  func.func @_genblock_kernel(%arg0: i32, %arg1: memref<64x48xbf16, #tpu.memory_space<vmem>>, %arg2: memref<64x32xbf16, #tpu.memory_space<vmem>>, %arg3: memref<64x32xbf16, #tpu.memory_space<vmem>>, %arg4: memref<48x160xf32, #tpu.memory_space<vmem>>, %arg5: memref<32x32xf32, #tpu.memory_space<vmem>>, %arg6: memref<8x128xf32, #tpu.memory_space<vmem>>, %arg7: memref<64x32xf32, #tpu.memory_space<vmem>>) attributes {dimension_semantics = [#tpu.dimension_semantics<parallel>], iteration_bounds = array<i64: 1>, scalar_prefetch = 0 : i64, scratch_operands = 0 : i64, tpu.core_type = #tpu.core_type<tc>, window_params = [{transform_indices = @transform_0, window_bounds = array<i64: 64, 48>}, {transform_indices = @transform_1, window_bounds = array<i64: 64, 32>}, {transform_indices = @transform_2, window_bounds = array<i64: 64, 32>}, {pipeline_mode = #tpu.pipeline_mode<synchronous>, transform_indices = @transform_3, window_bounds = array<i64: 48, 160>}, {pipeline_mode = #tpu.pipeline_mode<synchronous>, transform_indices = @transform_4, window_bounds = array<i64: 32, 32>}, {pipeline_mode = #tpu.pipeline_mode<synchronous>, transform_indices = @transform_5, window_bounds = array<i64: 8, 128>}, {transform_indices = @transform_6, window_bounds = array<i64: 64, 32>}]} {
    %c0 = arith.constant 0 : index
    %c0_0 = arith.constant 0 : index
    %0 = vector.load %arg6[%c0, %c0_0] : memref<8x128xf32, #tpu.memory_space<vmem>>, vector<8x128xf32>
    %1 = vector.extract_strided_slice %0 {offsets = [0, 0], sizes = [1, 32], strides = [1, 1]} : vector<8x128xf32> to vector<1x32xf32>
    %2 = vector.extract_strided_slice %0 {offsets = [1, 0], sizes = [1, 32], strides = [1, 1]} : vector<8x128xf32> to vector<1x32xf32>
    %3 = vector.extract_strided_slice %0 {offsets = [2, 0], sizes = [1, 32], strides = [1, 1]} : vector<8x128xf32> to vector<1x32xf32>
    %4 = vector.extract_strided_slice %0 {offsets = [3, 0], sizes = [1, 128], strides = [1, 1]} : vector<8x128xf32> to vector<1x128xf32>
    %c0_1 = arith.constant 0 : index
    %c0_2 = arith.constant 0 : index
    %5 = vector.load %arg1[%c0_1, %c0_2] : memref<64x48xbf16, #tpu.memory_space<vmem>>, vector<64x48xbf16>
    %6 = arith.extf %5 : vector<64x48xbf16> to vector<64x48xf32>
    %c0_3 = arith.constant 0 : index
    %c0_4 = arith.constant 0 : index
    %7 = vector.load %arg2[%c0_3, %c0_4] : memref<64x32xbf16, #tpu.memory_space<vmem>>, vector<64x32xbf16>
    %8 = arith.extf %7 : vector<64x32xbf16> to vector<64x32xf32>
    %c0_5 = arith.constant 0 : index
    %c0_6 = arith.constant 0 : index
    %9 = vector.load %arg3[%c0_5, %c0_6] : memref<64x32xbf16, #tpu.memory_space<vmem>>, vector<64x32xbf16>
    %10 = arith.extf %9 : vector<64x32xbf16> to vector<64x32xf32>
    %c0_7 = arith.constant 0 : index
    %c0_8 = arith.constant 0 : index
    %11 = vector.load %arg4[%c0_7, %c0_8] : memref<48x160xf32, #tpu.memory_space<vmem>>, vector<48x160xf32>
    %cst = arith.constant dense<0.000000e+00> : vector<64x160xf32>
    %12 = tpu.matmul %6, %11, %cst {dimension_numbers = #tpu.dot_dimension_numbers<[1], [0], [0], [1], [0, 0, 1, 1], [], []>} : vector<64x48xf32>, vector<48x160xf32>, vector<64x160xf32> -> vector<64x160xf32>
    %13 = vector.extract_strided_slice %12 {offsets = [0, 0], sizes = [64, 32], strides = [1, 1]} : vector<64x160xf32> to vector<64x32xf32>
    %14 = vector.broadcast %1 : vector<1x32xf32> to vector<64x32xf32>
    %15 = arith.addf %13, %14 : vector<64x32xf32>
    %16 = vector.extract_strided_slice %12 {offsets = [0, 32], sizes = [64, 128], strides = [1, 1]} : vector<64x160xf32> to vector<64x128xf32>
    %17 = vector.broadcast %4 : vector<1x128xf32> to vector<64x128xf32>
    %18 = arith.addf %16, %17 : vector<64x128xf32>
    %19 = vector.extract_strided_slice %18 {offsets = [0, 0], sizes = [64, 32], strides = [1, 1]} : vector<64x128xf32> to vector<64x32xf32>
    %20 = vector.extract_strided_slice %18 {offsets = [0, 32], sizes = [64, 32], strides = [1, 1]} : vector<64x128xf32> to vector<64x32xf32>
    %21 = vector.extract_strided_slice %18 {offsets = [0, 64], sizes = [64, 32], strides = [1, 1]} : vector<64x128xf32> to vector<64x32xf32>
    %22 = vector.extract_strided_slice %18 {offsets = [0, 96], sizes = [64, 32], strides = [1, 1]} : vector<64x128xf32> to vector<64x32xf32>
    %23 = vector.broadcast %2 : vector<1x32xf32> to vector<64x32xf32>
    %24 = arith.mulf %23, %8 : vector<64x32xf32>
    %25 = arith.addf %15, %24 : vector<64x32xf32>
    %cst_9 = arith.constant 0.000000e+00 : f32
    %26 = vector.broadcast %cst_9 : f32 to vector<64x32xf32>
    %27 = arith.cmpf oge, %25, %26 : vector<64x32xf32>
    %cst_10 = arith.constant 2.000000e-01 : f32
    %28 = vector.broadcast %cst_10 : f32 to vector<64x32xf32>
    %29 = arith.mulf %28, %25 : vector<64x32xf32>
    %30 = arith.select %27, %25, %29 : vector<64x32xi1>, vector<64x32xf32>
    %cst_11 = arith.constant dense<0.000000e+00> : vector<64xf32>
    %31 = vector.multi_reduction <add>, %30, %cst_11 [1] : vector<64x32xf32> to vector<64xf32>
    %32 = vector.shape_cast %31 : vector<64xf32> to vector<64x1xf32>
    %cst_12 = arith.constant 3.200000e+01 : f32
    %33 = vector.broadcast %cst_12 : f32 to vector<64x1xf32>
    %34 = arith.divf %32, %33 : vector<64x1xf32>
    %35 = arith.mulf %30, %30 : vector<64x32xf32>
    %cst_13 = arith.constant dense<0.000000e+00> : vector<64xf32>
    %36 = vector.multi_reduction <add>, %35, %cst_13 [1] : vector<64x32xf32> to vector<64xf32>
    %37 = vector.shape_cast %36 : vector<64xf32> to vector<64x1xf32>
    %cst_14 = arith.constant 3.200000e+01 : f32
    %38 = vector.broadcast %cst_14 : f32 to vector<64x1xf32>
    %39 = arith.divf %37, %38 : vector<64x1xf32>
    %40 = arith.mulf %34, %34 : vector<64x1xf32>
    %41 = arith.subf %39, %40 : vector<64x1xf32>
    %cst_15 = arith.constant 0.000000e+00 : f32
    %42 = vector.broadcast %cst_15 : f32 to vector<64x1xf32>
    %43 = arith.maximumf %41, %42 : vector<64x1xf32>
    %44 = vector.broadcast %34 : vector<64x1xf32> to vector<64x32xf32>
    %45 = arith.subf %30, %44 : vector<64x32xf32>
    %cst_16 = arith.constant 9.99999974E-6 : f32
    %46 = vector.broadcast %cst_16 : f32 to vector<64x1xf32>
    %47 = arith.addf %43, %46 : vector<64x1xf32>
    %48 = math.rsqrt %47 : vector<64x1xf32>
    %49 = vector.broadcast %48 : vector<64x1xf32> to vector<64x32xf32>
    %50 = arith.mulf %45, %49 : vector<64x32xf32>
    %51 = arith.mulf %19, %50 : vector<64x32xf32>
    %52 = arith.addf %51, %20 : vector<64x32xf32>
    %c0_17 = arith.constant 0 : index
    %c0_18 = arith.constant 0 : index
    %53 = vector.load %arg5[%c0_17, %c0_18] : memref<32x32xf32, #tpu.memory_space<vmem>>, vector<32x32xf32>
    %cst_19 = arith.constant dense<0.000000e+00> : vector<64x32xf32>
    %54 = tpu.matmul %52, %53, %cst_19 {dimension_numbers = #tpu.dot_dimension_numbers<[1], [0], [0], [1], [0, 0, 1, 1], [], []>} : vector<64x32xf32>, vector<32x32xf32>, vector<64x32xf32> -> vector<64x32xf32>
    %55 = vector.broadcast %1 : vector<1x32xf32> to vector<64x32xf32>
    %56 = arith.addf %54, %55 : vector<64x32xf32>
    %57 = vector.broadcast %3 : vector<1x32xf32> to vector<64x32xf32>
    %58 = arith.mulf %57, %10 : vector<64x32xf32>
    %59 = arith.addf %56, %58 : vector<64x32xf32>
    %cst_20 = arith.constant 0.000000e+00 : f32
    %60 = vector.broadcast %cst_20 : f32 to vector<64x32xf32>
    %61 = arith.cmpf oge, %59, %60 : vector<64x32xf32>
    %cst_21 = arith.constant 2.000000e-01 : f32
    %62 = vector.broadcast %cst_21 : f32 to vector<64x32xf32>
    %63 = arith.mulf %62, %59 : vector<64x32xf32>
    %64 = arith.select %61, %59, %63 : vector<64x32xi1>, vector<64x32xf32>
    %cst_22 = arith.constant dense<0.000000e+00> : vector<64xf32>
    %65 = vector.multi_reduction <add>, %64, %cst_22 [1] : vector<64x32xf32> to vector<64xf32>
    %66 = vector.shape_cast %65 : vector<64xf32> to vector<64x1xf32>
    %cst_23 = arith.constant 3.200000e+01 : f32
    %67 = vector.broadcast %cst_23 : f32 to vector<64x1xf32>
    %68 = arith.divf %66, %67 : vector<64x1xf32>
    %69 = arith.mulf %64, %64 : vector<64x32xf32>
    %cst_24 = arith.constant dense<0.000000e+00> : vector<64xf32>
    %70 = vector.multi_reduction <add>, %69, %cst_24 [1] : vector<64x32xf32> to vector<64xf32>
    %71 = vector.shape_cast %70 : vector<64xf32> to vector<64x1xf32>
    %cst_25 = arith.constant 3.200000e+01 : f32
    %72 = vector.broadcast %cst_25 : f32 to vector<64x1xf32>
    %73 = arith.divf %71, %72 : vector<64x1xf32>
    %74 = arith.mulf %68, %68 : vector<64x1xf32>
    %75 = arith.subf %73, %74 : vector<64x1xf32>
    %cst_26 = arith.constant 0.000000e+00 : f32
    %76 = vector.broadcast %cst_26 : f32 to vector<64x1xf32>
    %77 = arith.maximumf %75, %76 : vector<64x1xf32>
    %78 = vector.broadcast %68 : vector<64x1xf32> to vector<64x32xf32>
    %79 = arith.subf %64, %78 : vector<64x32xf32>
    %cst_27 = arith.constant 9.99999974E-6 : f32
    %80 = vector.broadcast %cst_27 : f32 to vector<64x1xf32>
    %81 = arith.addf %77, %80 : vector<64x1xf32>
    %82 = math.rsqrt %81 : vector<64x1xf32>
    %83 = vector.broadcast %82 : vector<64x1xf32> to vector<64x32xf32>
    %84 = arith.mulf %79, %83 : vector<64x32xf32>
    %85 = arith.mulf %21, %84 : vector<64x32xf32>
    %86 = arith.addf %85, %22 : vector<64x32xf32>
    %c0_28 = arith.constant 0 : index
    %c0_29 = arith.constant 0 : index
    %87 = vector.load %arg7[%c0_28, %c0_29] : memref<64x32xf32, #tpu.memory_space<vmem>>, vector<64x32xf32>
    tpu.vector_store %arg7[%c0_28, %c0_29], %86 {strides = array<i32>} : memref<64x32xf32, #tpu.memory_space<vmem>>, vector<64x32xf32>,
    return
  }
  func.func @transform_0(%arg0: i32) -> (i32, i32) {
    %c0_i32 = arith.constant 0 : i32
    %c0_i32_0 = arith.constant 0 : i32
    return %arg0, %c0_i32 : i32, i32
  }
  func.func @transform_1(%arg0: i32) -> (i32, i32) {
    %c0_i32 = arith.constant 0 : i32
    %c0_i32_0 = arith.constant 0 : i32
    return %arg0, %c0_i32 : i32, i32
  }
  func.func @transform_2(%arg0: i32) -> (i32, i32) {
    %c0_i32 = arith.constant 0 : i32
    %c0_i32_0 = arith.constant 0 : i32
    return %arg0, %c0_i32 : i32, i32
  }
  func.func @transform_3(%arg0: i32) -> (i32, i32) {
    %c0_i32 = arith.constant 0 : i32
    %c0_i32_0 = arith.constant 0 : i32
    %c0_i32_1 = arith.constant 0 : i32
    return %c0_i32, %c0_i32_0 : i32, i32
  }
  func.func @transform_4(%arg0: i32) -> (i32, i32) {
    %c0_i32 = arith.constant 0 : i32
    %c0_i32_0 = arith.constant 0 : i32
    %c0_i32_1 = arith.constant 0 : i32
    return %c0_i32, %c0_i32_0 : i32, i32
  }
  func.func @transform_5(%arg0: i32) -> (i32, i32) {
    %c0_i32 = arith.constant 0 : i32
    %c0_i32_0 = arith.constant 0 : i32
    %c0_i32_1 = arith.constant 0 : i32
    return %c0_i32, %c0_i32_0 : i32, i32
  }
  func.func @transform_6(%arg0: i32) -> (i32, i32) {
    %c0_i32 = arith.constant 0 : i32
    %c0_i32_0 = arith.constant 0 : i32
    return %arg0, %c0_i32 : i32, i32
  }
}

</mosaic_0001>

<bundles_post_ra>
// kernel: tpu_custom_call.1
= control target key start
LH: loop header
LB: loop body
LE: loop exit
PB: predicated region body
PF: predicated region fallthrough
CT: control target
= control target key end

     0   :  { %v1109_v3 = vmov 0.0   ;;  %vm84_vm0 = vcmask 392192   ;;  %v222_v25 = vlaneseq  ;;  %vm302_vm1 = vcmask 261120   ;;  %s1111_s12 = smov 96   ;;  %s1680_s3 = inlined_call_operand.vmem [shape: f32[48,160], index: 3, kind: input, shape index: {}]   ;;  %s1681_s0 = inlined_call_operand.vmem [shape: bf16[64,48], index: 0, kind: input, shape index: {}]   ;;  %s1682_s1 = inlined_call_operand.vmem [shape: bf16[64,32], index: 1, kind: input, shape index: {}]   ;;  %s1683_s5 = inlined_call_operand.vmem [shape: f32[8,128], index: 5, kind: input, shape index: {}]   ;;  %s1684_s4 = inlined_call_operand.vmem [shape: f32[32,32], index: 4, kind: input, shape index: {}]   ;;  %s1685_s2 = inlined_call_operand.vmem [shape: bf16[64,32], index: 2, kind: input, shape index: {}]   ;;  %s1686_s6 = inlined_call_operand.vmem [shape: f32[64,32], index: 6, kind: output, shape index: {}]  }
   0x1   :  { %v83_v0 = vld [vmem:[%s1680_s3 + $0x58] sm:$0xff]  ;;  %v82_v1 = vld [vmem:[%s1680_s3 + $0x50] sm:$0xff]  ;;  %v81_v2 = vld [vmem:[%s1680_s3 + $0x48] sm:$0xff]  ;;  %173 = vmatprep.mubr.f32.mxu0 %v1109_v3  ;;  %209 = vmatprep.mubr.f32.mxu1 %v1109_v3 }
   0x2   :  { %129 = vmatprep.subr.mxu0 %v83_v0  ;;  %1062 = vmatprep.subr.mxu1 %v83_v0  ;;  %v80_v4 = vld [vmem:[%s1680_s3 + $0x40] sm:$0xff]  ;;  %v79_v5 = vld [vmem:[%s1680_s3 + $0x38] sm:$0xff]  ;;  %v78_v6 = vld [vmem:[%s1680_s3 + $0x30] sm:$0xff]  ;;  %v1203_v26 = vshrl.u32 %v222_v25, 7 }
   0x3   :  { %130 = vmatpush1.msra.mxu0 %v82_v1  ;;  %1068 = vmatpush1.msra.mxu1 %v82_v1  ;;  %v77_v7 = vld [vmem:[%s1680_s3 + $0x28] sm:$0xff]  ;;  %v76_v8 = vld [vmem:[%s1680_s3 + $0x20] sm:$0xff]  ;;  %v75_v9 = vld [vmem:[%s1680_s3 + $0x18] sm:$0xff] }
   0x4   :  { %131 = vmatprep.subr.mxu0 %v81_v2  ;;  %1063 = vmatprep.subr.mxu1 %v81_v2  ;;  %v974_v10 = vld [vmem:[%s1681_s0] sm:$0xff]   ;;  %v1023_v11 = vld [vmem:[%s1681_s0 + $0x18] sm:$0xff]   ;;  %v74_v12 = vld [vmem:[%s1680_s3 + $0x10] sm:$0xff]  ;;  %v260_v27 = vsub.s32 1, %v1203_v26  ;;  %v224_v31 = vsub.s32 0, %v1203_v26 }
   0x5   :  { %132 = vmatpush1.msra.mxu0 %v80_v4  ;;  %1069 = vmatpush1.msra.mxu1 %v80_v4  ;;  %v73_v13 = vld [vmem:[%s1680_s3 + $0x8] sm:$0xff]  ;;  %v72_v14 = vld [vmem:[%s1680_s3] sm:$0xff]  ;;  %v975_v15 = vunpack.c.l.bf16 %v974_v10  ;;  %v987_v16 = vunpack.c.l.bf16 %v1023_v11  ;;  %v976_v17 = vunpack.c.h.bf16 %v974_v10  ;;  %v988_v18 = vunpack.c.h.bf16 %v1023_v11  ;;  %v1022_v22 = vld [vmem:[%s1681_s0 + $0x10] sm:$0xff]  }
   0x6   :  { %133 = vmatprep.subr.mxu0 %v79_v5  ;;  %1064 = vmatprep.subr.mxu1 %v79_v5  ;;  %v1021_v19 = vld [vmem:[%s1681_s0 + $0x8] sm:$0xff]   ;;  %v983_v23 = vunpack.c.l.bf16 %v1022_v22  ;;  %v984_v24 = vunpack.c.h.bf16 %v1022_v22  ;;  %v1209_v28 = vld [vmem:[%s1683_s5] sm:$0xff]  ;;  %v1026_v30 = vld [vmem:[%s1682_s1 + $0x18] sm:$0xff]  }
   0x7   :  { %134 = vmatpush1.msra.mxu0 %v78_v6  ;;  %1070 = vmatpush1.msra.mxu1 %v78_v6  ;;  %v979_v20 = vunpack.c.l.bf16 %v1021_v19  ;;  %v980_v21 = vunpack.c.h.bf16 %v1021_v19  ;;  %v990_v29 = vld [vmem:[%s1682_s1] sm:$0xff]   ;;  %v1219_v33 = vrot.slane %v1209_v28, %v260_v27  ;;  %v1003_v34 = vunpack.c.l.bf16 %v1026_v30  ;;  %v1024_v44 = vld [vmem:[%s1682_s1 + $0x8] sm:$0xff]  }
   0x8   :  { %135 = vmatprep.subr.mxu0 %v77_v7  ;;  %1065 = vmatprep.subr.mxu1 %v77_v7  ;;  %v991_v32 = vunpack.c.l.bf16 %v990_v29  ;;  %v1222_v35 = vrot.slane %v1209_v28, %v224_v31  ;;  %v992_v38 = vunpack.c.h.bf16 %v990_v29  ;;  %v1004_v39 = vunpack.c.h.bf16 %v1026_v30 }
   0x9   :  { %136 = vmatpush1.msra.mxu0 %v76_v8  ;;  %1071 = vmatpush1.msra.mxu1 %v76_v8  ;;  %v268_v37 = vmul.f32 %v1003_v34, %v1219_v33  ;;  %v995_v53 = vunpack.c.l.bf16 %v1024_v44  ;;  %v996_v62 = vunpack.c.h.bf16 %v1024_v44 }
   0xa   :  { %137 = vmatprep.subr.mxu0 %v75_v9  ;;  %1066 = vmatprep.subr.mxu1 %v75_v9  ;;  %v262_v36 = vmul.f32 %v991_v32, %v1219_v33  ;;  %v263_v49 = vmul.f32 %v992_v38, %v1219_v33  ;;  %v269_v50 = vmul.f32 %v1004_v39, %v1219_v33 }
   0xb   :  { %138 = vmatpush1.msra.mxu0 %v74_v12  ;;  %1072 = vmatpush1.msra.mxu1 %v74_v12  ;;  %v264_v1 = vmul.f32 %v995_v53, %v1219_v33  ;;  %v265_v10 = vmul.f32 %v996_v62, %v1219_v33 }
   0xc   :  { %139 = vmatprep.subr.mxu0 %v73_v13  ;;  %1067 = vmatprep.subr.mxu1 %v73_v13 }
   0xd   :  { %140 = vmatpush1.msra.mxu0 %v72_v14  ;;  %1073 = vmatpush1.msra.mxu1 %v72_v14 }
   0xe   :  { %957 = vmatmul.mubr.msk.f32.vlgmr.msra.gmra.mxu0 %vm84_vm0, %v975_v15  ;;  %963 = vmatmul.mubr.msk.f32.vlgmr.msra.gmra.mxu1 %vm84_vm0, %v987_v16 }
   0xf   :  { %179 = vmatprep.mubr.f32.mxu0 %v1109_v3  ;;  %215 = vmatprep.mubr.f32.mxu1 %v1109_v3 }
  0x12   :  { %958 = vmatmul.mubr.msk.f32.gmra.mxu0 %vm84_vm0, %v976_v17  ;;  %964 = vmatmul.mubr.msk.f32.gmra.mxu1 %vm84_vm0, %v988_v18 }
  0x13   :  { %185 = vmatprep.mubr.f32.mxu0 %v1109_v3 }
  0x16   :  { %959 = vmatmul.mubr.msk.f32.gmra.mxu0 %vm84_vm0, %v979_v20 }
  0x17   :  { %191 = vmatprep.mubr.f32.mxu0 %v1109_v3 }
  0x1a   :  { %960 = vmatmul.mubr.msk.f32.gmra.mxu0 %vm84_vm0, %v980_v21 }
  0x1b   :  { %197 = vmatprep.mubr.f32.mxu0 %v1109_v3 }
  0x1e   :  { %961 = vmatmul.mubr.msk.f32.gmra.mxu0 %vm84_vm0, %v983_v23 }
  0x1f   :  { %203 = vmatprep.mubr.f32.mxu0 %v1109_v3  ;;  %v1025_v3 = vld [vmem:[%s1682_s1 + $0x10] sm:$0xff]   ;;  %s1110_s1 = smov 32  }
  0x20   :  { %v999_v11 = vunpack.c.l.bf16 %v1025_v3  ;;  %v1000_v23 = vunpack.c.h.bf16 %v1025_v3 }
  0x22   :  { %962 = vmatmul.mubr.msk.f32.gmra.mxu0 %vm84_vm0, %v984_v24  ;;  %v266_v27 = vmul.f32 %v999_v11, %v1219_v33 }
  0xce   :  { %v1226_v40 = vpop.f32.mrf.mxu0  ;;  %v1228_v41 = vpop.f32.mrf.mxu1 }
  0xcf   :  { %v226_v42 = vadd.f32 %v1222_v35, %v1226_v40  ;;  %v232_v43 = vadd.f32 %v1222_v35, %v1228_v41 }
  0xd0   :  { %v1237_v45 = vpop.f32.mrf.mxu0  ;;  %v1239_v46 = vpop.f32.mrf.mxu1 }
  0xd1   :  { %v270_v47 = vadd.f32 %v262_v36, %v226_v42  ;;  %v276_v48 = vadd.f32 %v268_v37, %v232_v43  ;;  %v267_v36 = vmul.f32 %v1000_v23, %v1219_v33 }
  0xd2   :  { %v1243_v51 = vpop.f32.mrf.mxu0  ;;  %v1245_v52 = vpop.f32.mrf.mxu1 }
  0xd3   :  { %v227_v54 = vadd.f32 %v1222_v35, %v1243_v51  ;;  %v233_v55 = vadd.f32 %v1222_v35, %v1245_v52  ;;  %vm278_vm2 = vcmp.ge.f32.partialorder %v270_v47, 0.0  ;;  %v286_v56 = vmul.f32 0.2, %v270_v47 }
  0xd4   :  { %v1251_v57 = vpop.f32.mrf.mxu0  ;;  %vm284_vm3 = vcmp.ge.f32.partialorder %v276_v48, 0.0  ;;  %v292_v58 = vmul.f32 0.2, %v276_v48 }
  0xd5   :  { %v271_v59 = vadd.f32 %v263_v49, %v227_v54  ;;  %v277_v60 = vadd.f32 %v269_v50, %v233_v55  ;;  %v1253_v61 = vsel %vm278_vm2, %v270_v47, %v286_v56 }
  0xd6   :  { %v303_v63 = vsel %vm302_vm1, %v1253_v61, 0.0  ;;  %v1257_v0 = vpop.f32.mrf.mxu0  ;;  %v336_v2 = vmul.f32 %v1253_v61, %v1253_v61  ;;  %v1267_v6 = vsel %vm284_vm3, %v276_v48, %v292_v58 }
  0xd7   :  { %v287_v4 = vmul.f32 0.2, %v271_v59  ;;  %304 = vadd.xlane.f32.xlu0 %v303_v63  ;;  %v228_v5 = vadd.f32 %v1222_v35, %v1257_v0  ;;  %vm285_vm4 = vcmp.ge.f32.partialorder %v277_v60, 0.0  ;;  %v293_v9 = vmul.f32 0.2, %v277_v60 }
  0xd8   :  { %v344_v7 = vsel %vm302_vm1, %v336_v2, 0.0  ;;  %v1270_v8 = vpop.f32.mrf.mxu0  ;;  %vm279_vm5 = vcmp.ge.f32.partialorder %v271_v59, 0.0  ;;  %v321_v13 = vsel %vm302_vm1, %v1267_v6, 0.0  ;;  %v342_v16 = vmul.f32 %v1267_v6, %v1267_v6 }
  0xd9   :  { %345 = vadd.xlane.f32.xlu1 %v344_v7  ;;  %v1273_v12 = vsel %vm279_vm5, %v271_v59, %v287_v4  ;;  %v1279_v15 = vsel %vm285_vm4, %v277_v60, %v293_v9  ;;  %v272_v18 = vadd.f32 %v264_v1, %v228_v5  ;;  %v236_v7 = vsub.s32 3, %v1203_v26 }
  0xda   :  { %v1277_v14 = vpop.f32.mrf.mxu0  ;;  %v337_v17 = vmul.f32 %v1273_v12, %v1273_v12  ;;  %v324_v20 = vsel %vm302_vm1, %v1279_v15, 0.0  ;;  %v362_v24 = vsel %vm302_vm1, %v342_v16, 0.0  ;;  %v306_v38 = vsel %vm302_vm1, %v1273_v12, 0.0 }
  0xdb   :  { %322 = vadd.xlane.f32.xlu0 %v321_v13  ;;  %v229_v19 = vadd.f32 %v1222_v35, %v1277_v14  ;;  %v288_v32 = vmul.f32 0.2, %v272_v18  ;;  %vm280_vm7 = vcmp.ge.f32.partialorder %v272_v18, 0.0  ;;  %v343_v3 = vmul.f32 %v1279_v15, %v1279_v15 }
  0xdc   :  { %v1289_v21 = vpop.f32.mrf.mxu0  ;;  %v347_v29 = vsel %vm302_vm1, %v337_v17, 0.0  ;;  %v237_v9 = vrot.slane %v1209_v28, %v236_v7 }
  0xdd   :  { %v273_v22 = vadd.f32 %v265_v10, %v229_v19  ;;  %325 = vadd.xlane.f32.xlu1 %v324_v20  ;;  %v1313_v48 = vsel %vm280_vm7, %v272_v18, %v288_v32  ;;  %v365_v5 = vsel %vm302_vm1, %v343_v3, 0.0 }
  0xde   :  { %v1292_v25 = vpop.f32.mrf.mxu0  ;;  %v309_v49 = vsel %vm302_vm1, %v1313_v48, 0.0  ;;  %v338_v53 = vmul.f32 %v1313_v48, %v1313_v48 }
  0xdf   :  { %363 = vadd.xlane.f32.xlu0 %v362_v24  ;;  %v230_v30 = vadd.f32 %v1222_v35, %v1292_v25  ;;  %vm281_vm6 = vcmp.ge.f32.partialorder %v273_v22, 0.0  ;;  %v289_v31 = vmul.f32 0.2, %v273_v22 }
  0xe0   :  { %v1298_v34 = vpop.f32.mrf.mxu0  ;;  %v350_v58 = vsel %vm302_vm1, %v338_v53, 0.0 }
  0xe1   :  { %348 = vadd.xlane.f32.xlu1 %v347_v29  ;;  %v1301_v37 = vsel %vm281_vm6, %v273_v22, %v289_v31  ;;  %v274_v44 = vadd.f32 %v266_v27, %v230_v30 }
  0xe2   :  { %v1305_v39 = vpop.f32.mrf.mxu0  ;;  %v312_v42 = vsel %vm302_vm1, %v1301_v37, 0.0  ;;  %v339_v43 = vmul.f32 %v1301_v37, %v1301_v37 }
  0xe3   :  { %307 = vadd.xlane.f32.xlu0 %v306_v38  ;;  %v231_v47 = vadd.f32 %v1222_v35, %v1305_v39  ;;  %v290_v55 = vmul.f32 0.2, %v274_v44  ;;  %vm282_vm9 = vcmp.ge.f32.partialorder %v274_v44, 0.0 }
  0xe4   :  { %v353_v50 = vsel %vm302_vm1, %v339_v43, 0.0 }
  0xe5   :  { %v275_v33 = vadd.f32 %v267_v36, %v231_v47  ;;  %313 = vadd.xlane.f32.xlu1 %v312_v42  ;;  %v1327_v62 = vsel %vm282_vm9, %v274_v44, %v290_v55 }
  0xe6   :  { %v315_v63 = vsel %vm302_vm1, %v1327_v62, 0.0  ;;  %v340_v2 = vmul.f32 %v1327_v62, %v1327_v62 }
  0xe7   :  { %310 = vadd.xlane.f32.xlu0 %v309_v49  ;;  %vm283_vm8 = vcmp.ge.f32.partialorder %v275_v33, 0.0  ;;  %v291_v54 = vmul.f32 0.2, %v275_v33 }
  0xe8   :  { %v356_v4 = vsel %vm302_vm1, %v340_v2, 0.0 }
  0xe9   :  { %354 = vadd.xlane.f32.xlu1 %v353_v50  ;;  %v1320_v56 = vsel %vm283_vm8, %v275_v33, %v291_v54 }
  0xea   :  { %v318_v59 = vsel %vm302_vm1, %v1320_v56, 0.0  ;;  %v341_v60 = vmul.f32 %v1320_v56, %v1320_v56 }
  0xeb   :  { %351 = vadd.xlane.f32.xlu0 %v350_v58 }
  0xec   :  { %v359_v1 = vsel %vm302_vm1, %v341_v60, 0.0 }
  0xed   :  { %319 = vadd.xlane.f32.xlu1 %v318_v59 }
  0xef   :  { %316 = vadd.xlane.f32.xlu0 %v315_v63 }
  0xf1   :  { %360 = vadd.xlane.f32.xlu1 %v359_v1 }
  0xf3   :  { %357 = vadd.xlane.f32.xlu0 %v356_v4 }
  0xf5   :  { %366 = vadd.xlane.f32.xlu1 %v365_v5 }
 0x109   :  { %239 = vrot.lane.b32.xlu0 %v237_v9, %s1110_s1 }
 0x160   :  { %v305_v10 = vpop.xlane.xlu0 %304 }
 0x161   :  { %v1341_v18 = vmul.f32 0.03125, %v305_v10 }
 0x162   :  { %v346_v11 = vpop.xlane.xlu1 %345 }
 0x163   :  { %v376_v22 = vmul.f32 %v1341_v18, %v1341_v18  ;;  %v368_v23 = vmul.f32 0.03125, %v346_v11 }
 0x164   :  { %v323_v13 = vpop.xlane.xlu0 %322 }
 0x165   :  { %v384_v32 = vsub.f32 %v368_v23, %v376_v22  ;;  %v1359_v63 = vmul.f32 0.03125, %v323_v13 }
 0x166   :  { %v326_v16 = vpop.xlane.xlu1 %325 }
 0x167   :  { %v392_v49 = vmax.f32 %v384_v32, 0.0  ;;  %v1365_v11 = vmul.f32 0.03125, %v326_v16 }
 0x168   :  { %v364_v17 = vpop.xlane.xlu0 %363 }
 0x169   :  { %v408_v3 = vadd.f32 1e-05, %v392_v49 }
 0x16a   :  { %v349_v19 = vpop.xlane.xlu1 %348 }
 0x16b   :  { %v369_v43 = vmul.f32 0.03125, %v349_v19  ;;  %v374_v19 = vmul.f32 0.03125, %v364_v17 }
 0x16c   :  { %v308_v20 = vpop.xlane.xlu0 %307 }
 0x16d   :  { %v1345_v24 = vmul.f32 0.03125, %v308_v20 }
 0x16e   :  { %v314_v27 = vpop.xlane.xlu1 %313 }
 0x16f   :  { %v1347_v29 = vmul.f32 0.03125, %v314_v27  ;;  %v377_v36 = vmul.f32 %v1345_v24, %v1345_v24  ;;  %v382_v27 = vmul.f32 %v1359_v63, %v1359_v63 }
 0x170   :  { %v311_v30 = vpop.xlane.xlu0 %310 }
 0x171   :  { %v379_v31 = vmul.f32 %v1347_v29, %v1347_v29  ;;  %v1353_v44 = vmul.f32 0.03125, %v311_v30  ;;  %v385_v50 = vsub.f32 %v369_v43, %v377_v36  ;;  %v383_v36 = vmul.f32 %v1365_v11, %v1365_v11 }
 0x172   :  { %v355_v38 = vpop.xlane.xlu1 %354  ;;  %v390_v43 = vsub.f32 %v374_v19, %v382_v27 }
 0x173   :  { %v371_v42 = vmul.f32 0.03125, %v355_v38  ;;  %v378_v59 = vmul.f32 %v1353_v44, %v1353_v44  ;;  %v393_v4 = vmax.f32 %v385_v50, 0.0 }
 0x174   :  { %v352_v47 = vpop.xlane.xlu0 %351 }
 0x175   :  { %v387_v33 = vsub.f32 %v371_v42, %v379_v31  ;;  %v370_v53 = vmul.f32 0.03125, %v352_v47  ;;  %v409_v30 = vadd.f32 1e-05, %v393_v4 }
 0x176   :  { %v320_v54 = vpop.xlane.xlu1 %319 }
 0x177   :  { %v395_v55 = vmax.f32 %v387_v33, 0.0  ;;  %v1355_v58 = vmul.f32 0.03125, %v320_v54  ;;  %v386_v5 = vsub.f32 %v370_v53, %v378_v59 }
 0x178   :  { %v317_v60 = vpop.xlane.xlu0 %316 }
 0x179   :  { %v411_v1 = vadd.f32 1e-05, %v395_v55  ;;  %v381_v2 = vmul.f32 %v1355_v58, %v1355_v58  ;;  %v1363_v7 = vmul.f32 0.03125, %v317_v60  ;;  %v394_v31 = vmax.f32 %v386_v5, 0.0 }
 0x17a   :  { %v361_v9 = vpop.xlane.xlu1 %360  ;;  %v398_v60 = vmax.f32 %v390_v43, 0.0  ;;  %v403_v5 = vsub.f32 %v1301_v37, %v1347_v29  ;;  %v401_v37 = vsub.f32 %v1273_v12, %v1345_v24 }
 0x17b   :  { %v373_v10 = vmul.f32 0.03125, %v361_v9  ;;  %1077 = vrsqrt.f32 %v411_v1  ;;  %v380_v13 = vmul.f32 %v1363_v7, %v1363_v7  ;;  %v410_v50 = vadd.f32 1e-05, %v394_v31 }
 0x17c   :  { %v358_v20 = vpop.xlane.xlu0 %357  ;;  %1079 = vrsqrt.f32 %v408_v3  ;;  %v414_v3 = vadd.f32 1e-05, %v398_v60  ;;  %v400_v9 = vsub.f32 %v1253_v61, %v1341_v18  ;;  %v404_v12 = vsub.f32 %v1327_v62, %v1363_v7 }
 0x17d   :  { %v389_v22 = vsub.f32 %v373_v10, %v381_v2  ;;  %v372_v23 = vmul.f32 0.03125, %v358_v20  ;;  %1081 = vrsqrt.f32 %v409_v30  ;;  %v406_v62 = vsub.f32 %v1267_v6, %v1359_v63 }
 0x17e   :  { %v367_v32 = vpop.xlane.xlu1 %366 }
 0x17f   :  { %v397_v16 = vmax.f32 %v389_v22, 0.0  ;;  %v388_v38 = vsub.f32 %v372_v23, %v380_v13  ;;  %v375_v17 = vmul.f32 0.03125, %v367_v32  ;;  %v407_v13 = vsub.f32 %v1279_v15, %v1365_v11 }
 0x180   :  { %v1373_v42 = vpop.permute.xlu0 %239 }
 0x181   :  { %v413_v47 = vadd.f32 1e-05, %v397_v16  ;;  %v391_v33 = vsub.f32 %v375_v17, %v383_v36  ;;  %v1377_v49 = vadd.f32 %v1373_v42, %v1243_v51  ;;  %v396_v53 = vmax.f32 %v388_v38, 0.0  ;;  %v512_v36 = vld [vmem:[%s1684_s4] sm:$0xff] }
 0x182   :  { %v1381_v54 = vadd.f32 %v1373_v42, %v1226_v40  ;;  %v1389_v51 = vadd.f32 %v1373_v42, %v1277_v14  ;;  %v1393_v40 = vadd.f32 %v1373_v42, %v1257_v0  ;;  %v1401_v2 = vadd.f32 %v1373_v42, %v1305_v39 }
 0x183   :  { %1083 = vrsqrt.f32 %v413_v47  ;;  %v399_v55 = vmax.f32 %v391_v33, 0.0  ;;  %482 = vrot.lane.b32.xlu0 %v1377_v49, %s1111_s12  ;;  %v412_v1 = vadd.f32 1e-05, %v396_v53  ;;  %v1405_v4 = vadd.f32 %v1373_v42, %v1292_v25 }
 0x184   :  { %480 = vrot.lane.b32.xlu1 %v1381_v54, %s1111_s12  ;;  %1085 = vrsqrt.f32 %v410_v50  ;;  %v405_v25 = vsub.f32 %v1320_v56, %v1355_v58  ;;  %v402_v56 = vsub.f32 %v1313_v48, %v1353_v44  ;;  %v1433_v15 = vadd.f32 %v1373_v42, %v1245_v52  ;;  %v515_v48 = vld [vmem:[%s1684_s4 + $0x18] sm:$0xff]  ;;  %v514_v44 = vld [vmem:[%s1684_s4 + $0x10] sm:$0xff]  ;;  %v513_v52 = vld [vmem:[%s1684_s4 + $0x8] sm:$0xff] }
 0x185   :  { %v415_v59 = vadd.f32 1e-05, %v399_v55  ;;  %1042 = vmatprep.subr.mxu1 %v515_v48  ;;  %v1452_v30 = vadd.f32 %v1373_v42, %v1228_v41 }
 0x186   :  { %1043 = vmatpush3.msra.mxu1 %v515_v48 }
 0x187   :  { %1087 = vrsqrt.f32 %v415_v59  ;;  %486 = vrot.lane.b32.xlu0 %v1389_v51, %s1111_s12  ;;  %1044 = vmatprep.subr.mxu1 %v514_v44 }
 0x188   :  { %484 = vrot.lane.b32.xlu1 %v1393_v40, %s1111_s12  ;;  %v1078_v14 = vpop.eup %1077  ;;  %1089 = vrsqrt.f32 %v412_v1  ;;  %1045 = vmatpush3.msra.mxu1 %v514_v44  ;;  %v663_v44 = vsub.s32 2, %v1203_v26 }
 0x189   :  { %v1080_v0 = vpop.eup %1079  ;;  %v427_v39 = vmul.f32 %v1078_v14, %v403_v5  ;;  %1091 = vrsqrt.f32 %v414_v3  ;;  %1046 = vmatprep.subr.mxu1 %v513_v52 }
 0x18a   :  { %v424_v10 = vmul.f32 %v1080_v0, %v400_v9  ;;  %v1082_v19 = vpop.eup %1081  ;;  %1047 = vmatpush3.msra.mxu1 %v513_v52  ;;  %v1488_v52 = vrot.slane %v1209_v28, %v663_v44 }
 0x18b   :  { %490 = vrot.lane.b32.xlu0 %v1401_v2, %s1111_s12  ;;  %v425_v61 = vmul.f32 %v1082_v19, %v401_v37  ;;  %1048 = vmatprep.subr.mxu1 %v512_v36 }
 0x18c   :  { %488 = vrot.lane.b32.xlu1 %v1405_v4, %s1111_s12  ;;  %1049 = vmatpush3.msra.mxu1 %v512_v36 }
 0x18f   :  { %446 = vrot.lane.b32.xlu0 %v427_v39, %s1110_s1 }
 0x190   :  { %v1084_v20 = vpop.eup %1083  ;;  %440 = vrot.lane.b32.xlu1 %v424_v10, %s1110_s1 }
 0x191   :  { %v429_v29 = vmul.f32 %v1084_v20, %v405_v25  ;;  %v1086_v18 = vpop.eup %1085 }
 0x192   :  { %v426_v23 = vmul.f32 %v1086_v18, %v402_v56 }
 0x193   :  { %450 = vrot.lane.b32.xlu0 %v429_v29, %s1110_s1 }
 0x194   :  { %v1088_v22 = vpop.eup %1087  ;;  %442 = vrot.lane.b32.xlu1 %v425_v61, %s1110_s1 }
 0x195   :  { %v431_v58 = vmul.f32 %v1088_v22, %v407_v13  ;;  %v1090_v27 = vpop.eup %1089 }
 0x196   :  { %v428_v24 = vmul.f32 %v1090_v27, %v404_v12  ;;  %v1092_v11 = vpop.eup %1091 }
 0x197   :  { %454 = vrot.lane.b32.xlu0 %v431_v58, %s1110_s1  ;;  %v430_v7 = vmul.f32 %v1092_v11, %v406_v62  ;;  %v1006_v11 = vld [vmem:[%s1685_s2] sm:$0xff]  }
 0x198   :  { %444 = vrot.lane.b32.xlu1 %v426_v23, %s1110_s1  ;;  %v1008_v62 = vunpack.c.h.bf16 %v1006_v11 }
 0x19b   :  { %494 = vrot.lane.b32.xlu0 %v1433_v15, %s1111_s12 }
 0x19c   :  { %448 = vrot.lane.b32.xlu1 %v428_v24, %s1110_s1 }
 0x1a0   :  { %452 = vrot.lane.b32.xlu1 %v430_v7, %s1110_s1  ;;  %v1007_v7 = vunpack.c.l.bf16 %v1006_v11 }
 0x1a4   :  { %492 = vrot.lane.b32.xlu1 %v1452_v30, %s1111_s12 }
 0x1f5   :  { %v483_v6 = vpop.permute.xlu0 %482 }
 0x1f6   :  { %v481_v63 = vpop.permute.xlu1 %480 }
 0x1f9   :  { %v487_v31 = vpop.permute.xlu0 %486 }
 0x1fa   :  { %v485_v32 = vpop.permute.xlu1 %484 }
 0x1fd   :  { %v491_v16 = vpop.permute.xlu0 %490 }
 0x1fe   :  { %v489_v38 = vpop.permute.xlu1 %488 }
 0x201   :  { %v447_v17 = vpop.permute.xlu0 %446 }
 0x202   :  { %v441_v43 = vpop.permute.xlu1 %440  ;;  %v467_v55 = vmul.f32 %v447_v17, %v1389_v51 }
 0x203   :  { %v464_v41 = vmul.f32 %v441_v43, %v1381_v54 }
 0x204   :  { %v507_v3 = vadd.f32 %v487_v31, %v467_v55  ;;  %v666_v31 = vmul.f32 %v1008_v62, %v1488_v52 }
 0x205   :  { %v504_v47 = vadd.f32 %v481_v63, %v464_v41  ;;  %v451_v33 = vpop.permute.xlu0 %450  ;;  %v1493_v63 = vpop.f32.mrf.mxu1 }
 0x206   :  { %v443_v50 = vpop.permute.xlu1 %442  ;;  %v469_v0 = vmul.f32 %v451_v33, %v1401_v2 }
 0x207   :  { %v465_v53 = vmul.f32 %v443_v50, %v1377_v49  ;;  %524 = vrot.lane.b32.xlu1 %v504_v47, %s1111_s12 }
 0x208   :  { %v509_v10 = vadd.f32 %v491_v16, %v469_v0  ;;  %v665_v16 = vmul.f32 %v1007_v7, %v1488_v52 }
 0x209   :  { %v505_v59 = vadd.f32 %v483_v6, %v465_v53  ;;  %v455_v14 = vpop.permute.xlu0 %454  ;;  %v1027_v6 = vld [vmem:[%s1685_s2 + $0x8] sm:$0xff]   ;;  %v1028_v53 = vld [vmem:[%s1685_s2 + $0x10] sm:$0xff]  }
 0x20a   :  { %v445_v60 = vpop.permute.xlu1 %444  ;;  %v471_v37 = vmul.f32 %v455_v14, %v1433_v15  ;;  %v1012_v36 = vunpack.c.h.bf16 %v1027_v6  ;;  %v1011_v17 = vunpack.c.l.bf16 %v1027_v6 }
 0x20b   :  { %v466_v1 = vmul.f32 %v445_v60, %v1393_v40  ;;  %526 = vrot.lane.b32.xlu0 %v505_v59, %s1111_s12  ;;  %v1015_v60 = vunpack.c.l.bf16 %v1028_v53 }
 0x20c   :  { %v668_v41 = vmul.f32 %v1012_v36, %v1488_v52  ;;  %v667_v59 = vmul.f32 %v1011_v17, %v1488_v52 }
 0x20d   :  { %v506_v5 = vadd.f32 %v485_v32, %v466_v1  ;;  %v495_v25 = vpop.permute.xlu0 %494 }
 0x20e   :  { %v449_v9 = vpop.permute.xlu1 %448  ;;  %v511_v29 = vadd.f32 %v495_v25, %v471_v37 }
 0x20f   :  { %v468_v39 = vmul.f32 %v449_v9, %v1405_v4  ;;  %530 = vrot.lane.b32.xlu0 %v507_v3, %s1111_s12  ;;  %528 = vrot.lane.b32.xlu1 %v506_v5, %s1111_s12 }
 0x211   :  { %v508_v19 = vadd.f32 %v489_v38, %v468_v39 }
 0x212   :  { %v453_v20 = vpop.permute.xlu1 %452 }
 0x213   :  { %534 = vrot.lane.b32.xlu0 %v509_v10, %s1111_s12  ;;  %532 = vrot.lane.b32.xlu1 %v508_v19, %s1111_s12  ;;  %v470_v61 = vmul.f32 %v453_v20, %v1452_v30  ;;  %v1016_v10 = vunpack.c.h.bf16 %v1028_v53 }
 0x216   :  { %v493_v18 = vpop.permute.xlu1 %492 }
 0x217   :  { %v510_v13 = vadd.f32 %v493_v18, %v470_v61  ;;  %538 = vrot.lane.b32.xlu0 %v511_v29, %s1111_s12  ;;  %v669_v61 = vmul.f32 %v1015_v60, %v1488_v52 }
 0x219   :  { %536 = vrot.lane.b32.xlu1 %v510_v13, %s1111_s12 }
 0x279   :  { %v525_v22 = vpop.permute.xlu1 %524 }
 0x27a   :  { %1050 = vmatprep.mubr.msk.f32.mxu1 %vm302_vm1, %v525_v22  ;;  %v1029_v22 = vld [vmem:[%s1685_s2 + $0x18] sm:$0xff]  }
 0x27d   :  { %v527_v56 = vpop.permute.xlu0 %526 }
 0x27e   :  { %1051 = vmatmul.mubr.msk.f32.vlgmr.msra.gmra.mxu1 %vm302_vm1, %v527_v56 }
 0x281   :  { %v531_v58 = vpop.permute.xlu0 %530  ;;  %v529_v23 = vpop.permute.xlu1 %528 }
 0x282   :  { %1053 = vmatprep.mubr.msk.f32.mxu1 %vm302_vm1, %v529_v23 }
 0x283   :  { %1054 = vmatmul.mubr.msk.f32.gmra.mxu1 %vm302_vm1, %v531_v58 }
 0x285   :  { %v535_v27 = vpop.permute.xlu0 %534  ;;  %v533_v12 = vpop.permute.xlu1 %532 }
 0x286   :  { %1056 = vmatprep.mubr.msk.f32.mxu1 %vm302_vm1, %v533_v12 }
 0x287   :  { %1057 = vmatmul.mubr.msk.f32.gmra.mxu1 %vm302_vm1, %v535_v27  ;;  %v1019_v27 = vunpack.c.l.bf16 %v1029_v22 }
 0x289   :  { %v539_v48 = vpop.permute.xlu0 %538  ;;  %v671_v36 = vmul.f32 %v1019_v27, %v1488_v52  ;;  %v245_v27 = vadd.f32 %v1373_v42, %v1251_v57 }
 0x28b   :  { %v537_v24 = vpop.permute.xlu1 %536 }
 0x28c   :  { %1059 = vmatprep.mubr.msk.f32.mxu1 %vm302_vm1, %v537_v24  ;;  %v670_v24 = vmul.f32 %v1016_v10, %v1488_v52 }
 0x28d   :  { %1060 = vmatmul.mubr.msk.f32.gmra.mxu1 %vm302_vm1, %v539_v48 }
 0x33e   :  { %v1052_v32 = vpop.f32.mrf.mxu1 }
 0x33f   :  { %v628_v26 = vadd.f32 %v1052_v32, %v1222_v35 }
 0x340   :  { %v622_v38 = vpop.f32.mrf.mxu1 }
 0x341   :  { %v674_v43 = vadd.f32 %v666_v31, %v628_v26  ;;  %v623_v28 = vadd.f32 %v622_v38, %v1222_v35 }
 0x343   :  { %v690_v47 = vmul.f32 0.2, %v674_v43  ;;  %v673_v33 = vadd.f32 %v665_v16, %v623_v28  ;;  %v1055_v50 = vpop.f32.mrf.mxu1  ;;  %vm682_vm10 = vcmp.ge.f32.partialorder %v674_v43, 0.0  ;;  %v1020_v16 = vunpack.c.h.bf16 %v1029_v22 }
 0x344   :  { %v638_v55 = vadd.f32 %v1055_v50, %v1222_v35 }
 0x345   :  { %v689_v1 = vmul.f32 0.2, %v673_v33  ;;  %v632_v14 = vpop.f32.mrf.mxu1  ;;  %v1505_v3 = vsel %vm682_vm10, %v674_v43, %v690_v47  ;;  %vm681_vm11 = vcmp.ge.f32.partialorder %v673_v33, 0.0 }
 0x346   :  { %v676_v0 = vadd.f32 %v668_v41, %v638_v55  ;;  %v633_v5 = vadd.f32 %v632_v14, %v1222_v35  ;;  %v708_v9 = vsel %vm302_vm1, %v1505_v3, 0.0  ;;  %v738_v39 = vmul.f32 %v1505_v3, %v1505_v3 }
 0x347   :  { %709 = vadd.xlane.f32.xlu0 %v708_v9  ;;  %v1058_v19 = vpop.f32.mrf.mxu1  ;;  %v1512_v25 = vsel %vm681_vm11, %v673_v33, %v689_v1  ;;  %v672_v55 = vmul.f32 %v1020_v16, %v1488_v52 }
 0x348   :  { %v692_v20 = vmul.f32 0.2, %v676_v0  ;;  %v675_v37 = vadd.f32 %v667_v59, %v633_v5  ;;  %v705_v29 = vsel %vm302_vm1, %v1512_v25, 0.0  ;;  %v737_v13 = vmul.f32 %v1512_v25, %v1512_v25 }
 0x349   :  { %706 = vadd.xlane.f32.xlu1 %v705_v29  ;;  %v642_v18 = vpop.f32.mrf.mxu1  ;;  %vm684_vm12 = vcmp.ge.f32.partialorder %v676_v0, 0.0  ;;  %v748_v23 = vsel %vm302_vm1, %v738_v39, 0.0  ;;  %v648_v12 = vadd.f32 %v1058_v19, %v1222_v35 }
 0x34a   :  { %v691_v56 = vmul.f32 0.2, %v675_v37  ;;  %v643_v58 = vadd.f32 %v642_v18, %v1222_v35  ;;  %v1526_v48 = vsel %vm684_vm12, %v676_v0, %v692_v20  ;;  %vm683_vm13 = vcmp.ge.f32.partialorder %v675_v37, 0.0 }
 0x34b   :  { %749 = vadd.xlane.f32.xlu0 %v748_v23  ;;  %v745_v11 = vsel %vm302_vm1, %v737_v13, 0.0  ;;  %v714_v32 = vsel %vm302_vm1, %v1526_v48, 0.0  ;;  %v678_v26 = vadd.f32 %v670_v24, %v648_v12  ;;  %v740_v33 = vmul.f32 %v1526_v48, %v1526_v48  ;;  %v207_v12 = vpop.f32.mrf.mxu0 }
 0x34c   :  { %v677_v44 = vadd.f32 %v669_v61, %v643_v58  ;;  %v1529_v62 = vsel %vm683_vm13, %v675_v37, %v691_v56  ;;  %v243_v56 = vadd.f32 %v1373_v42, %v1237_v45  ;;  %v247_v58 = vadd.f32 %v1373_v42, %v1270_v8 }
 0x34d   :  { %746 = vadd.xlane.f32.xlu1 %v745_v11  ;;  %v1061_v7 = vpop.f32.mrf.mxu1  ;;  %v739_v6 = vmul.f32 %v1529_v62, %v1529_v62  ;;  %v711_v47 = vsel %vm302_vm1, %v1529_v62, 0.0  ;;  %v694_v50 = vmul.f32 0.2, %v678_v26  ;;  %vm686_vm15 = vcmp.ge.f32.partialorder %v678_v26, 0.0 }
 0x34e   :  { %v693_v31 = vmul.f32 0.2, %v677_v44  ;;  %vm685_vm14 = vcmp.ge.f32.partialorder %v677_v44, 0.0  ;;  %v658_v53 = vadd.f32 %v1061_v7, %v1222_v35  ;;  %v754_v14 = vsel %vm302_vm1, %v740_v33, 0.0 }
 0x34f   :  { %715 = vadd.xlane.f32.xlu0 %v714_v32  ;;  %v652_v38 = vpop.f32.mrf.mxu1  ;;  %v751_v17 = vsel %vm302_vm1, %v739_v6, 0.0  ;;  %v1551_v5 = vsel %vm686_vm15, %v678_v26, %v694_v50  ;;  %v251_v23 = vadd.f32 %v1373_v42, %v1298_v34  ;;  %v249_v45 = vadd.f32 %v1373_v42, %v1289_v21 }
 0x350   :  { %v653_v43 = vadd.f32 %v652_v38, %v1222_v35  ;;  %v1538_v28 = vsel %vm685_vm14, %v677_v44, %v693_v31  ;;  %v680_v0 = vadd.f32 %v672_v55, %v658_v53  ;;  %v720_v9 = vsel %vm302_vm1, %v1551_v5, 0.0 }
 0x351   :  { %752 = vadd.xlane.f32.xlu1 %v751_v17  ;;  %v717_v59 = vsel %vm302_vm1, %v1538_v28, 0.0  ;;  %v741_v60 = vmul.f32 %v1538_v28, %v1538_v28  ;;  %v742_v39 = vmul.f32 %v1551_v5, %v1551_v5  ;;  %v253_v8 = vadd.f32 %v1373_v42, %v207_v12 }
 0x352   :  { %v679_v41 = vadd.f32 %v671_v36, %v653_v43  ;;  %v696_v10 = vmul.f32 0.2, %v680_v0  ;;  %vm688_vm2 = vcmp.ge.f32.partialorder %v680_v0, 0.0 }
 0x353   :  { %712 = vadd.xlane.f32.xlu0 %v711_v47  ;;  %v757_v35 = vsel %vm302_vm1, %v741_v60, 0.0  ;;  %v760_v37 = vsel %vm302_vm1, %v742_v39, 0.0 }
 0x354   :  { %v695_v1 = vmul.f32 0.2, %v679_v41  ;;  %vm687_vm0 = vcmp.ge.f32.partialorder %v679_v41, 0.0  ;;  %v1565_v29 = vsel %vm688_vm2, %v680_v0, %v696_v10 }
 0x355   :  { %718 = vadd.xlane.f32.xlu1 %v717_v59  ;;  %v726_v18 = vsel %vm302_vm1, %v1565_v29, 0.0  ;;  %v744_v13 = vmul.f32 %v1565_v29, %v1565_v29 }
 0x356   :  { %v1554_v52 = vsel %vm687_vm0, %v679_v41, %v695_v1 }
 0x357   :  { %755 = vadd.xlane.f32.xlu0 %v754_v14  ;;  %v723_v19 = vsel %vm302_vm1, %v1554_v52, 0.0  ;;  %v743_v20 = vmul.f32 %v1554_v52, %v1554_v52  ;;  %v766_v22 = vsel %vm302_vm1, %v744_v13, 0.0 }
 0x359   :  { %758 = vadd.xlane.f32.xlu1 %v757_v35  ;;  %v763_v61 = vsel %vm302_vm1, %v743_v20, 0.0 }
 0x35b   :  { %721 = vadd.xlane.f32.xlu0 %v720_v9 }
 0x35d   :  { %724 = vadd.xlane.f32.xlu1 %v723_v19 }
 0x35f   :  { %761 = vadd.xlane.f32.xlu0 %v760_v37 }
 0x361   :  { %764 = vadd.xlane.f32.xlu1 %v763_v61 }
 0x363   :  { %727 = vadd.xlane.f32.xlu0 %v726_v18 }
 0x367   :  { %767 = vadd.xlane.f32.xlu0 %v766_v22 }
 0x372   :  { %881 = vrot.lane.b32.xlu1 %v243_v56, %s1111_s12 }
 0x376   :  { %885 = vrot.lane.b32.xlu1 %v247_v58, %s1111_s12 }
 0x37a   :  { %889 = vrot.lane.b32.xlu1 %v251_v23, %s1111_s12 }
 0x37d   :  { %883 = vrot.lane.b32.xlu0 %v245_v27, %s1111_s12 }
 0x381   :  { %887 = vrot.lane.b32.xlu0 %v249_v45, %s1111_s12 }
 0x385   :  { %891 = vrot.lane.b32.xlu0 %v253_v8, %s1111_s12 }
 0x3d0   :  { %v710_v24 = vpop.xlane.xlu0 %709 }
 0x3d1   :  { %v730_v44 = vmul.f32 0.03125, %v710_v24 }
 0x3d2   :  { %v707_v34 = vpop.xlane.xlu1 %706 }
 0x3d3   :  { %v1590_v11 = vmul.f32 0.03125, %v707_v34  ;;  %v778_v6 = vmul.f32 %v730_v44, %v730_v44  ;;  %v802_v8 = vsub.f32 %v1505_v3, %v730_v44 }
 0x3d4   :  { %v750_v7 = vpop.xlane.xlu0 %749 }
 0x3d5   :  { %v770_v57 = vmul.f32 0.03125, %v750_v7  ;;  %v777_v32 = vmul.f32 %v1590_v11, %v1590_v11 }
 0x3d6   :  { %v747_v31 = vpop.xlane.xlu1 %746 }
 0x3d7   :  { %v786_v21 = vsub.f32 %v770_v57, %v778_v6  ;;  %v769_v36 = vmul.f32 0.03125, %v747_v31  ;;  %v801_v6 = vsub.f32 %v1512_v25, %v1590_v11 }
 0x3d8   :  { %v716_v26 = vpop.xlane.xlu0 %715 }
 0x3d9   :  { %v794_v16 = vmax.f32 %v786_v21, 0.0  ;;  %v785_v38 = vsub.f32 %v769_v36, %v777_v32  ;;  %v1594_v50 = vmul.f32 0.03125, %v716_v26 }
 0x3da   :  { %v753_v17 = vpop.xlane.xlu1 %752 }
 0x3db   :  { %v810_v43 = vadd.f32 1e-05, %v794_v16  ;;  %v793_v41 = vmax.f32 %v785_v38, 0.0  ;;  %v771_v59 = vmul.f32 0.03125, %v753_v17  ;;  %v780_v0 = vmul.f32 %v1594_v50, %v1594_v50 }
 0x3dc   :  { %v713_v47 = vpop.xlane.xlu0 %712 }
 0x3dd   :  { %1093 = vrsqrt.f32 %v810_v43  ;;  %v809_v33 = vadd.f32 1e-05, %v793_v41  ;;  %v1596_v53 = vmul.f32 0.03125, %v713_v47 }
 0x3de   :  { %v719_v55 = vpop.xlane.xlu1 %718 }
 0x3df   :  { %1095 = vrsqrt.f32 %v809_v33  ;;  %v779_v60 = vmul.f32 %v1596_v53, %v1596_v53  ;;  %v1600_v1 = vmul.f32 0.03125, %v719_v55 }
 0x3e0   :  { %v756_v14 = vpop.xlane.xlu0 %755 }
 0x3e1   :  { %v787_v35 = vsub.f32 %v771_v59, %v779_v60  ;;  %v772_v9 = vmul.f32 0.03125, %v756_v14  ;;  %v781_v19 = vmul.f32 %v1600_v1, %v1600_v1  ;;  %v804_v60 = vsub.f32 %v1526_v48, %v1594_v50 }
 0x3e2   :  { %v759_v39 = vpop.xlane.xlu1 %758 }
 0x3e3   :  { %v795_v10 = vmax.f32 %v787_v35, 0.0  ;;  %v788_v20 = vsub.f32 %v772_v9, %v780_v0  ;;  %v773_v37 = vmul.f32 0.03125, %v759_v39 }
 0x3e4   :  { %v722_v61 = vpop.xlane.xlu0 %721 }
 0x3e5   :  { %v796_v18 = vmax.f32 %v788_v20, 0.0  ;;  %v789_v13 = vsub.f32 %v773_v37, %v781_v19  ;;  %v734_v22 = vmul.f32 0.03125, %v722_v61  ;;  %v811_v56 = vadd.f32 1e-05, %v795_v10 }
 0x3e6   :  { %v725_v58 = vpop.xlane.xlu1 %724  ;;  %v803_v10 = vsub.f32 %v1529_v62, %v1596_v53  ;;  %v805_v37 = vsub.f32 %v1538_v28, %v1600_v1 }
 0x3e7   :  { %v812_v23 = vadd.f32 1e-05, %v796_v18  ;;  %v797_v27 = vmax.f32 %v789_v13, 0.0  ;;  %v735_v45 = vmul.f32 0.03125, %v725_v58  ;;  %v782_v24 = vmul.f32 %v734_v22, %v734_v22 }
 0x3e8   :  { %v762_v12 = vpop.xlane.xlu0 %761  ;;  %v806_v61 = vsub.f32 %v1551_v5, %v734_v22  ;;  %v255_v5 = vadd.f32 %v1373_v42, %v1239_v46 }
 0x3e9   :  { %1097 = vrsqrt.f32 %v812_v23  ;;  %v774_v34 = vmul.f32 0.03125, %v762_v12  ;;  %v813_v57 = vadd.f32 1e-05, %v797_v27  ;;  %v783_v32 = vmul.f32 %v735_v45, %v735_v45 }
 0x3ea   :  { %v1094_v7 = vpop.eup %1093  ;;  %1099 = vrsqrt.f32 %v811_v56  ;;  %v765_v31 = vpop.xlane.xlu1 %764  ;;  %v807_v56 = vsub.f32 %v1554_v52, %v735_v45  ;;  %v257_v52 = vadd.f32 %v1373_v42, %v1493_v63 }
 0x3eb   :  { %v790_v21 = vsub.f32 %v774_v34, %v782_v24  ;;  %v775_v36 = vmul.f32 0.03125, %v765_v31  ;;  %v826_v26 = vmul.f32 %v1094_v7, %v802_v8  ;;  %1101 = vrsqrt.f32 %v813_v57 }
 0x3ec   :  { %v1096_v16 = vpop.eup %1095  ;;  %v728_v38 = vpop.xlane.xlu0 %727 }
 0x3ed   :  { %v798_v17 = vmax.f32 %v790_v21, 0.0  ;;  %v791_v43 = vsub.f32 %v775_v36, %v783_v32  ;;  %v736_v41 = vmul.f32 0.03125, %v728_v38  ;;  %843 = vrot.lane.b32.xlu0 %v826_v26, %s1111_s12  ;;  %v825_v3 = vmul.f32 %v1096_v16, %v801_v6 }
 0x3ee   :  { %v882_v58 = vpop.permute.xlu1 %881 }
 0x3ef   :  { %v814_v44 = vadd.f32 1e-05, %v798_v17  ;;  %v799_v47 = vmax.f32 %v791_v43, 0.0  ;;  %841 = vrot.lane.b32.xlu1 %v825_v3, %s1111_s12  ;;  %v784_v33 = vmul.f32 %v736_v41, %v736_v41  ;;  %v808_v53 = vsub.f32 %v1565_v29, %v736_v41 }
 0x3f0   :  { %v768_v25 = vpop.xlane.xlu0 %767 }
 0x3f1   :  { %1103 = vrsqrt.f32 %v814_v44  ;;  %v815_v11 = vadd.f32 1e-05, %v799_v47  ;;  %v776_v55 = vmul.f32 0.03125, %v768_v25 }
 0x3f2   :  { %v886_v29 = vpop.permute.xlu1 %885 }
 0x3f3   :  { %1105 = vrsqrt.f32 %v815_v11  ;;  %v792_v59 = vsub.f32 %v776_v55, %v784_v33 }
 0x3f4   :  { %v884_v22 = vpop.permute.xlu0 %883 }
 0x3f5   :  { %v800_v14 = vmax.f32 %v792_v59, 0.0 }
 0x3f6   :  { %v1098_v0 = vpop.eup %1097  ;;  %v890_v45 = vpop.permute.xlu1 %889 }
 0x3f7   :  { %v1100_v35 = vpop.eup %1099  ;;  %v816_v9 = vadd.f32 1e-05, %v800_v14  ;;  %v828_v39 = vmul.f32 %v1098_v0, %v804_v60 }
 0x3f8   :  { %v827_v19 = vmul.f32 %v1100_v35, %v803_v10  ;;  %v1102_v20 = vpop.eup %1101  ;;  %v888_v23 = vpop.permute.xlu0 %887 }
 0x3f9   :  { %1107 = vrsqrt.f32 %v816_v9  ;;  %847 = vrot.lane.b32.xlu1 %v828_v39, %s1111_s12  ;;  %v829_v50 = vmul.f32 %v1102_v20, %v805_v37 }
 0x3fc   :  { %v892_v27 = vpop.permute.xlu0 %891 }
 0x3fd   :  { %845 = vrot.lane.b32.xlu1 %v827_v19, %s1111_s12 }
 0x3fe   :  { %v1104_v48 = vpop.eup %1103 }
 0x3ff   :  { %v830_v18 = vmul.f32 %v1104_v48, %v806_v61 }
 0x400   :  { %v1106_v13 = vpop.eup %1105 }
 0x401   :  { %849 = vrot.lane.b32.xlu1 %v829_v50, %s1111_s12  ;;  %851 = vrot.lane.b32.xlu0 %v830_v18, %s1111_s12  ;;  %v831_v62 = vmul.f32 %v1106_v13, %v807_v56 }
 0x405   :  { %853 = vrot.lane.b32.xlu1 %v831_v62, %s1111_s12 }
 0x406   :  { %v1108_v28 = vpop.eup %1107 }
 0x407   :  { %v832_v1 = vmul.f32 %v1108_v28, %v808_v53 }
 0x409   :  { %893 = vrot.lane.b32.xlu1 %v255_v5, %s1111_s12  ;;  %855 = vrot.lane.b32.xlu0 %v832_v1, %s1111_s12 }
 0x40d   :  { %895 = vrot.lane.b32.xlu0 %v257_v52, %s1111_s12 }
 0x45f   :  { %v844_v12 = vpop.permute.xlu0 %843 }
 0x460   :  { %v866_v8 = vmul.f32 %v844_v12, %v1377_v49 }
 0x461   :  { %v842_v46 = vpop.permute.xlu1 %841 }
 0x462   :  { %v906_v24 = vadd.f32 %v884_v22, %v866_v8  ;;  %v865_v34 = vmul.f32 %v842_v46, %v1381_v54 }
 0x464   :  { %v905_v7 = vadd.f32 %v882_v58, %v865_v34  ;;  %923 = vrot.lane.b32.xlu0 %v906_v24, %s1110_s1 }
 0x466   :  { %921 = vrot.lane.b32.xlu1 %v905_v7, %s1110_s1 }
 0x46b   :  { %v848_v42 = vpop.permute.xlu1 %847 }
 0x46c   :  { %v868_v63 = vmul.f32 %v848_v42, %v1389_v51 }
 0x46e   :  { %v908_v6 = vadd.f32 %v888_v23, %v868_v63 }
 0x46f   :  { %v846_v57 = vpop.permute.xlu1 %845 }
 0x470   :  { %v867_v31 = vmul.f32 %v846_v57, %v1393_v40  ;;  %927 = vrot.lane.b32.xlu0 %v908_v6, %s1110_s1 }
 0x472   :  { %v907_v32 = vadd.f32 %v886_v29, %v867_v31 }
 0x473   :  { %v850_v49 = vpop.permute.xlu1 %849  ;;  %v852_v21 = vpop.permute.xlu0 %851 }
 0x474   :  { %v869_v36 = vmul.f32 %v850_v49, %v1405_v4  ;;  %v870_v54 = vmul.f32 %v852_v21, %v1401_v2  ;;  %925 = vrot.lane.b32.xlu1 %v907_v32, %s1110_s1 }
 0x476   :  { %v909_v26 = vadd.f32 %v890_v45, %v869_v36  ;;  %v910_v16 = vadd.f32 %v892_v27, %v870_v54 }
 0x477   :  { %v854_v38 = vpop.permute.xlu1 %853 }
 0x478   :  { %929 = vrot.lane.b32.xlu1 %v909_v26, %s1110_s1  ;;  %931 = vrot.lane.b32.xlu0 %v910_v16, %s1110_s1  ;;  %v871_v51 = vmul.f32 %v854_v38, %v1452_v30 }
 0x47b   :  { %v894_v40 = vpop.permute.xlu1 %893  ;;  %v856_v17 = vpop.permute.xlu0 %855 }
 0x47c   :  { %v911_v43 = vadd.f32 %v894_v40, %v871_v51  ;;  %v872_v41 = vmul.f32 %v856_v17, %v1433_v15 }
 0x47e   :  { %933 = vrot.lane.b32.xlu1 %v911_v43, %s1110_s1 }
 0x47f   :  { %v896_v4 = vpop.permute.xlu0 %895 }
 0x480   :  { %v912_v2 = vadd.f32 %v896_v4, %v872_v41 }
 0x482   :  { %935 = vrot.lane.b32.xlu0 %v912_v2, %s1110_s1 }
 0x4d6   :  { %v924_v3 = vpop.permute.xlu0 %923 }
 0x4d7   :  { %946 = vst.msk [vmem:[%s1686_s6 + $0x8] sm:$0xff] %vm302_vm1, %v924_v3 }
 0x4d8   :  { %v922_v44 = vpop.permute.xlu1 %921 }
 0x4d9   :  { %945 = vst.msk [vmem:[%s1686_s6] sm:$0xff] %vm302_vm1, %v922_v44 }
 0x4e2   :  { %v928_v30 = vpop.permute.xlu0 %927 }
 0x4e3   :  { %948 = vst.msk [vmem:[%s1686_s6 + $0x18] sm:$0xff] %vm302_vm1, %v928_v30 }
 0x4e6   :  { %v926_v15 = vpop.permute.xlu1 %925 }
 0x4e7   :  { %947 = vst.msk [vmem:[%s1686_s6 + $0x10] sm:$0xff] %vm302_vm1, %v926_v15 }
 0x4ea   :  { %v930_v47 = vpop.permute.xlu1 %929  ;;  %v932_v25 = vpop.permute.xlu0 %931 }
 0x4eb   :  { %949 = vst.msk [vmem:[%s1686_s6 + $0x20] sm:$0xff] %vm302_vm1, %v930_v47  ;;  %950 = vst.msk [vmem:[%s1686_s6 + $0x28] sm:$0xff] %vm302_vm1, %v932_v25 }
 0x4f0   :  { %v934_v11 = vpop.permute.xlu1 %933 }
 0x4f1   :  { %951 = vst.msk [vmem:[%s1686_s6 + $0x30] sm:$0xff] %vm302_vm1, %v934_v11 }
 0x4f4   :  { %v936_v33 = vpop.permute.xlu0 %935 }
 0x4f5   :  { %952 = vst.msk [vmem:[%s1686_s6 + $0x38] sm:$0xff] %vm302_vm1, %v936_v33 }

</bundles_post_ra>
